<compile_context>
chip_gen: v7x
topology: tpu7x:2x2x1
jax: 0.10.0
libtpu: 0.0.40
codegen_flags: <defaults>
</compile_context>

<pallas_src>
from functools import partial

import jax
import jax.numpy as jnp
from jax.experimental import pallas as pl
from jax.experimental.pallas import tpu as pltpu


# Per-output-tile VMEM cap (one buffer; Pallas double-buffers it) and the
# scoped VMEM limit we request.  2 * 8 MiB out + small input tiles << 32 MiB,
# which fits v7x (64 MiB physical), v6e (128 MiB) and v5e (128 MiB) alike.
_OUT_TILE_BYTES = 8 * 1024 * 1024
_VMEM_LIMIT_BYTES = 32 * 1024 * 1024


def _round_to_8(x: int) -> int:
    return max(8, (x // 8) * 8)


def _choose_tiles(B: int, R: int, D: int, out_bytes: int):
    """Pick (tb, tr) so one output tile tb*tr*D*out_bytes <= _OUT_TILE_BYTES.

    tr targets 128 rows (sublane friendly, lane dim D stays whole and last);
    tb takes whatever budget remains, capped at 512.  Dims smaller than the
    target use the full dim (allowed by the BlockSpec (8,128) rule).
    """
    max_elems = max(_OUT_TILE_BYTES // max(D * out_bytes, 1), 64)
    tr = R if R <= 128 else 128
    tb_cap = max(max_elems // max(tr, 1), 8)
    tb = B if B <= tb_cap else _round_to_8(min(tb_cap, 512))
    return tb, tr


def _dot_productor_kernel(bulk_ref, ref_ref, out_ref, *, activation):
    # bulk_ref: (tb, D), ref_ref: (tr, D), out_ref: (tb, tr, D)
    b = bulk_ref[...]                        # (tb, D)
    r = ref_ref[...]                         # (tr, D)
    expr = b[:, None, :] * r[None, :, :]     # (tb, tr, D) broadcasted multiply (VPU)
    if activation == "relu":
        expr = jnp.maximum(expr, 0.0)
    elif activation == "tanh":
        expr = jnp.tanh(expr)                # EUP; plenty of slack vs HBM on v5e/v6e
    # activation is None -> identity
    out_ref[...] = expr.astype(out_ref.dtype)


def dot_productor_single(bulk, reference, activation=None, *,
                         out_dtype=None, tb=None, tr=None):
    """Pallas implementation of DotProductor.forward for last_k == 1."""
    assert activation in ("relu", "tanh", None)
    B, D = bulk.shape
    R, Dr = reference.shape
    assert D == Dr, "feature dims must match for broadcasting"

    if out_dtype is None:
        out_dtype = jnp.result_type(bulk.dtype, reference.dtype)
    out_bytes = jnp.dtype(out_dtype).itemsize

    tb_auto, tr_auto = _choose_tiles(B, R, D, out_bytes)
    tb = tb_auto if tb is None else tb
    tr = tr_auto if tr is None else tr

    # cdiv + Pallas partial-block masking handles ragged B, R.
    grid = (pl.cdiv(B, tb), pl.cdiv(R, tr))

    kernel = partial(_dot_productor_kernel, activation=activation)

    return pl.pallas_call(
        kernel,
        out_shape=jax.ShapeDtypeStruct((B, R, D), out_dtype),
        grid_spec=pltpu.PrefetchScalarGridSpec(
            num_scalar_prefetch=0,
            grid=grid,
            in_specs=[
                # bulk block index constant over inner j loop -> reused, no re-DMA.
                pl.BlockSpec((tb, D), lambda i, j: (i, 0)),
                pl.BlockSpec((tr, D), lambda i, j: (j, 0)),
            ],
            out_specs=pl.BlockSpec((tb, tr, D), lambda i, j: (i, j, 0)),
        ),
        compiler_params=pltpu.CompilerParams(
            dimension_semantics=("parallel", "parallel"),
            vmem_limit_bytes=_VMEM_LIMIT_BYTES,
        ),
    )(bulk, reference)


def dot_productor_stacked(bulk, reference, activation=None, *,
                          out_dtype=None, tb=None, tr=None):
    """Fused last_k > 1 path: bulk (K,B,D), reference (K,R,D) -> (K,B,R,D)."""
    assert activation in ("relu", "tanh", None)
    K, B, D = bulk.shape
    Kr, R, Dr = reference.shape
    assert K == Kr and D == Dr

    if out_dtype is None:
        out_dtype = jnp.result_type(bulk.dtype, reference.dtype)
    out_bytes = jnp.dtype(out_dtype).itemsize

    tb_auto, tr_auto = _choose_tiles(B, R, D, out_bytes)
    tb = tb_auto if tb is None else tb
    tr = tr_auto if tr is None else tr

    grid = (K, pl.cdiv(B, tb), pl.cdiv(R, tr))
    kernel = partial(_dot_productor_kernel, activation=activation)

    return pl.pallas_call(
        kernel,
        out_shape=jax.ShapeDtypeStruct((K, B, R, D), out_dtype),
        grid_spec=pltpu.PrefetchScalarGridSpec(
            num_scalar_prefetch=0,
            grid=grid,
            in_specs=[
                # Leading K dim squeezed out of the kernel refs (same body as single).
                pl.BlockSpec((None, tb, D), lambda k, i, j: (k, i, 0)),
                pl.BlockSpec((None, tr, D), lambda k, i, j: (k, j, 0)),
            ],
            out_specs=pl.BlockSpec((None, tb, tr, D), lambda k, i, j: (k, i, j, 0)),
        ),
        compiler_params=pltpu.CompilerParams(
            dimension_semantics=("parallel", "parallel", "parallel"),
            vmem_limit_bytes=_VMEM_LIMIT_BYTES,
        ),
    )(bulk, reference)


def dot_productor(bulk, reference, activation=None, last_k=1, *, out_dtype=None):
    """Full DotProductor.forward: tensor path (last_k==1) or list path."""
    if last_k == 1:
        return dot_productor_single(bulk, reference, activation, out_dtype=out_dtype)

    bulks = list(bulk)
    refs = list(reference)
    same_shapes = (
        len(bulks) == len(refs)
        and len(bulks) > 0
        and all(b.shape == bulks[0].shape and b.dtype == bulks[0].dtype for b in bulks)
        and all(r.shape == refs[0].shape and r.dtype == refs[0].dtype for r in refs)
    )
    if same_shapes:
        stacked = dot_productor_stacked(jnp.stack(bulks), jnp.stack(refs),
                                        activation, out_dtype=out_dtype)
        return [stacked[k] for k in range(len(bulks))]
    # Ragged list: fall back to one call per pair (matches the PyTorch loop).
    return [dot_productor_single(b, r, activation, out_dtype=out_dtype)
            for b, r in zip(bulks, refs)]


def _reference_impl(bulk, reference, activation):
    expr = bulk[:, None, :] * reference[None, :, :]
    if activation == "relu":
        expr = jnp.maximum(expr, 0.0)
    elif activation == "tanh":
        expr = jnp.tanh(expr)
    return expr


if __name__ == "__main__":
    key = jax.random.PRNGKey(0)
    kb, kr, kb2, kr2, kb3, kr3, kb4, kr4 = jax.random.split(key, 8)

    # --- 1) small shapes, last_k == 1, all activations (grid (1,1)) ---------
    B, R, D = 8, 16, 128
    bulk = jax.random.normal(kb, (B, D), dtype=jnp.float32)
    reference = jax.random.normal(kr, (R, D), dtype=jnp.float32)
    for act in (None, "relu", "tanh"):
        out = jax.block_until_ready(dot_productor(bulk, reference, activation=act))
        ref = _reference_impl(bulk, reference, act)
        assert out.shape == (B, R, D)
        assert jnp.allclose(out, ref, atol=1e-5, rtol=1e-5)

    # --- 2) multi-block grid with auto tiles (exercises pipelining path) ----
    B2, R2 = 256, 256
    bulk_l = jax.random.normal(kb3, (B2, D), dtype=jnp.float32)
    ref_l = jax.random.normal(kr3, (R2, D), dtype=jnp.float32)
    out_l = jax.block_until_ready(dot_productor(bulk_l, ref_l, activation="relu"))
    assert jnp.allclose(out_l, _reference_impl(bulk_l, ref_l, "relu"),
                        atol=1e-5, rtol=1e-5)

    # --- 3) ragged shapes: B, R not multiples of the tiles (partial blocks) -
    B3, R3 = 24, 40
    bulk_r = jax.random.normal(kb4, (B3, D), dtype=jnp.float32)
    ref_r = jax.random.normal(kr4, (R3, D), dtype=jnp.float32)
    out_r = jax.block_until_ready(
        dot_productor_single(bulk_r, ref_r, activation="tanh", tb=16, tr=32))
    assert jnp.allclose(out_r, _reference_impl(bulk_r, ref_r, "tanh"),
                        atol=1e-5, rtol=1e-5)

    # --- 4) last_k > 1 path (fused single pallas_call over stacked pairs) ---
    bulk2 = jax.random.normal(kb2, (B, D), dtype=jnp.float32)
    ref2 = jax.random.normal(kr2, (R, D), dtype=jnp.float32)
    outs = dot_productor([bulk, bulk2], [reference, ref2],
                         activation="relu", last_k=2)
    outs = [jax.block_until_ready(o) for o in outs]
    for (b_in, r_in), o in zip([(bulk, reference), (bulk2, ref2)], outs):
        assert jnp.allclose(o, _reference_impl(b_in, r_in, "relu"),
                            atol=1e-5, rtol=1e-5)

    # --- 5) optional bf16 output (halves write traffic; looser tolerance) ---
    out_bf16 = jax.block_until_ready(
        dot_productor(bulk_l, ref_l, activation="relu", out_dtype=jnp.bfloat16))
    assert out_bf16.dtype == jnp.bfloat16
    assert jnp.allclose(out_bf16.astype(jnp.float32),
                        _reference_impl(bulk_l, ref_l, "relu"),
                        atol=5e-2, rtol=2e-2)

    print("KERNEL_OK")
</pallas_src>

<mosaic_0001>
module attributes {stable_mosaic.version = 11 : i64} {
  func.func @_dot_productor_kernel(%arg0: i32, %arg1: i32, %arg2: memref<8x128xf32, #tpu.memory_space<vmem>>, %arg3: memref<16x128xf32, #tpu.memory_space<vmem>>, %arg4: memref<8x16x128xf32, #tpu.memory_space<vmem>>) attributes {dimension_semantics = [#tpu.dimension_semantics<parallel>, #tpu.dimension_semantics<parallel>], iteration_bounds = array<i64: 1, 1>, scalar_prefetch = 0 : i64, scratch_operands = 0 : i64, tpu.core_type = #tpu.core_type<tc>, window_params = [{transform_indices = @transform_0, window_bounds = array<i64: 8, 128>}, {transform_indices = @transform_1, window_bounds = array<i64: 16, 128>}, {transform_indices = @transform_2, window_bounds = array<i64: 8, 16, 128>}]} {
    %c0 = arith.constant 0 : index
    %c0_0 = arith.constant 0 : index
    %0 = vector.load %arg2[%c0, %c0_0] : memref<8x128xf32, #tpu.memory_space<vmem>>, vector<8x128xf32>
    %c0_1 = arith.constant 0 : index
    %c0_2 = arith.constant 0 : index
    %1 = vector.load %arg3[%c0_1, %c0_2] : memref<16x128xf32, #tpu.memory_space<vmem>>, vector<16x128xf32>
    %2 = vector.shape_cast %0 : vector<8x128xf32> to vector<8x1x128xf32>
    %3 = vector.shape_cast %1 : vector<16x128xf32> to vector<1x16x128xf32>
    %4 = vector.broadcast %2 : vector<8x1x128xf32> to vector<8x16x128xf32>
    %5 = vector.broadcast %3 : vector<1x16x128xf32> to vector<8x16x128xf32>
    %6 = arith.mulf %4, %5 : vector<8x16x128xf32>
    %c0_3 = arith.constant 0 : index
    %c0_4 = arith.constant 0 : index
    %c0_5 = arith.constant 0 : index
    %7 = vector.load %arg4[%c0_3, %c0_4, %c0_5] : memref<8x16x128xf32, #tpu.memory_space<vmem>>, vector<8x16x128xf32>
    tpu.vector_store %arg4[%c0_3, %c0_4, %c0_5], %6 {strides = array<i32>} : memref<8x16x128xf32, #tpu.memory_space<vmem>>, vector<8x16x128xf32>,
    return
  }
  func.func @transform_0(%arg0: i32, %arg1: i32) -> (i32, i32) {
    %c0_i32 = arith.constant 0 : i32
    %c0_i32_0 = arith.constant 0 : i32
    return %arg0, %c0_i32 : i32, i32
  }
  func.func @transform_1(%arg0: i32, %arg1: i32) -> (i32, i32) {
    %c0_i32 = arith.constant 0 : i32
    %c0_i32_0 = arith.constant 0 : i32
    return %arg1, %c0_i32 : i32, i32
  }
  func.func @transform_2(%arg0: i32, %arg1: i32) -> (i32, i32, i32) {
    %c0_i32 = arith.constant 0 : i32
    %c0_i32_0 = arith.constant 0 : i32
    return %arg0, %arg1, %c0_i32 : i32, i32, i32
  }
}

</mosaic_0001>

<bundles_post_ra>
// kernel: tpu_custom_call.1
= control target key start
LH: loop header
LB: loop body
LE: loop exit
PB: predicated region body
PF: predicated region fallthrough
CT: control target
= control target key end

     0   :  { %7 = vsyncpa [#allocation3], 0  ;;  %s330_s0 = inlined_call_operand.hbm [shape: f32[8,128], index: 0, kind: input, shape index: {}]   ;;  %s331_s1 = inlined_call_operand.hbm [shape: f32[16,128], index: 1, kind: input, shape index: {}]   ;;  %s332_s2 = inlined_call_operand.hbm [shape: f32[8,16,128], index: 2, kind: output, shape index: {}]  }
   0x1   :  { %8 = vsyncpa [#allocation6], 0 }
   0x2   :  { %9 = vsyncpa [#allocation4], 0  ;;  %s260_s9 = smov [#allocation2]   ;;  %s261_s11 = smov [#allocation5]  }
   0x3   :  { %s16_s10 = sshll.u32 %s260_s9, 4  ;;  %s25_s12 = sshll.u32 %s261_s11, 4  ;;  %s17_s10 = int_to_ptr.vmem [resolvable:$true] %s16_s10  ;;  %s281_s12 = int_to_ptr.vmem [resolvable:$true] %s25_s12 }
   0x4   :  { %s188_s15 = scalar_lea.hbm %s330_s0, 128 }
   0x5   :  { %p189_p0 = scmp.ne.s32.totalorder %s330_s0, %s188_s15  ;;  %p192_p1 = scmp.lt.u32.totalorder %s188_s15, %s330_s0 }
   0x7   :  { %p194_p2 = pnand %p192_p1, %p189_p0 }
   0x9   :  { %197 = shalt.err (!%p194_p2)
}
   0xa   :  { %s198_s20 = scalar_lea.vmem %s17_s10, 128  ;;  %p203_p4 = scmp.lt.s32.totalorder %s17_s10, %s17_s10 }
   0xb   :  { %p199_p3 = scmp.ne.s32.totalorder %s17_s10, %s198_s20  ;;  %p204_p5 = scmp.lt.s32.totalorder %s198_s20, %s198_s20 }
   0xd   :  { %p205_p6 = por %p204_p5, %p203_p4 }
   0xf   :  { %p206_p7 = pnand %p205_p6, %p199_p3 }
  0x11   :  { %209 = shalt.err (!%p206_p7)
}
  0x12   :  { %19 = dma.hbm_to_vmem [thread:$0]  %s330_s0, 128, %s17_s10, [#allocation3]  }
  0x13   :  { %s210_s25 = scalar_lea.hbm %s331_s1, 256 }
  0x14   :  { %p211_p8 = scmp.ne.s32.totalorder %s331_s1, %s210_s25  ;;  %p214_p9 = scmp.lt.u32.totalorder %s210_s25, %s331_s1 }
  0x16   :  { %p216_p10 = pnand %p214_p9, %p211_p8 }
  0x18   :  { %219 = shalt.err (!%p216_p10)
}
  0x19   :  { %s220_s30 = scalar_lea.vmem %s281_s12, 256  ;;  %p225_p12 = scmp.lt.s32.totalorder %s281_s12, %s281_s12 }
  0x1a   :  { %p221_p11 = scmp.ne.s32.totalorder %s281_s12, %s220_s30  ;;  %p226_p13 = scmp.lt.s32.totalorder %s220_s30, %s220_s30 }
  0x1c   :  { %p227_p0 = por %p226_p13, %p225_p12 }
  0x1e   :  { %p228_p1 = pnand %p227_p0, %p221_p11 }
  0x20   :  { %231 = shalt.err (!%p228_p1)
}
  0x21   :  { %s262_s0 = smov 128   ;;  %s263_s3 = smov 8  }
  0x22   :  { %31 = dma.hbm_to_vmem [thread:$0]  %s331_s1, 256, %s281_s12, [#allocation6], %s262_s0, %s262_s0, %s263_s3  }
  0x23   :  { %254 = dma.done.wait [#allocation3], 128  }
  0x24   :  { %255 = vsyncadd [#allocation3], 4294967168 }
  0x25   :  { %256 = dma.done.wait [#allocation6], 256  }
  0x26   :  { %257 = vsyncadd [#allocation6], 4294967040  ;;  %v46_v0 = vlaneseq  ;;  %v264_v1 = vmov 1966171168   ;;  %v38_v6 = vld [vmem:[#allocation2] sm:$0xff]  ;;  %v39_v13 = vld [vmem:[#allocation5] sm:$0xff] }
  0x27   :  { %v44_v2 = vunpack.c.l.s4 %v264_v1  ;;  %v42_v9 = vcombine.high %v38_v6, %v38_v6  ;;  %v40_v14 = vld [vmem:[#allocation5 + $0x8] sm:$0xff]  ;;  %s265_s1 = smov [#allocation7]  }
  0x28   :  { %v47_v3 = vshrl.u32 %v46_v0, 7  ;;  %s168_s6 = sshll.u32 %s265_s1, 4  ;;  %s169_s6 = int_to_ptr.vmem [resolvable:$true] %s168_s6 }
  0x29   :  { %v45_v4 = vunpack.c.0.s8 %v44_v2  ;;  %s232_s7 = scalar_lea.vmem %s169_s6, 2048  ;;  %p237_p3 = scmp.lt.s32.totalorder %s169_s6, %s169_s6 }
  0x2a   :  { %v93_v8 = vsub.s32 0, %v47_v3  ;;  %p233_p2 = scmp.ne.s32.totalorder %s169_s6, %s232_s7  ;;  %p238_p4 = scmp.lt.s32.totalorder %s232_s7, %s232_s7 }
  0x2b   :  { %v48_v5 = vsub.s32 %v45_v4, %v47_v3 }
  0x2c   :  { %p239_p5 = por %p238_p4, %p237_p3 }
  0x2d   :  { %v49_v7 = vrot.slane %v38_v6, %v48_v5  ;;  %v56_v12 = vrot.slane %v42_v9, %v48_v5 }
  0x2e   :  { %p240_p6 = pnand %p239_p5, %p233_p2 }
  0x2f   :  { %v65_v10 = vrot.slane %v49_v7, %v48_v5  ;;  %v57_v11 = vcombine.high %v49_v7, %v49_v7  ;;  %v72_v18 = vrot.slane %v56_v12, %v48_v5  ;;  %v58_v19 = vcombine.high %v56_v12, %v56_v12 }
  0x31   :  { %v94_v15 = vrot.slane %v65_v10, %v93_v8  ;;  %v79_v16 = vrot.slane %v57_v11, %v48_v5  ;;  %v87_v17 = vcombine.high %v65_v10, %v65_v10  ;;  %v110_v25 = vrot.slane %v72_v18, %v93_v8 }
  0x32   :  { %v86_v26 = vrot.slane %v58_v19, %v48_v5  ;;  %v88_v27 = vcombine.high %v72_v18, %v72_v18 }
  0x33   :  { %v131_v20 = vmul.f32 %v94_v15, %v39_v13  ;;  %v132_v21 = vmul.f32 %v94_v15, %v40_v14  ;;  %v98_v22 = vrot.slane %v79_v16, %v93_v8  ;;  %v102_v23 = vrot.slane %v87_v17, %v93_v8 }
  0x34   :  { %v89_v24 = vcombine.high %v79_v16, %v79_v16  ;;  %v139_v33 = vmul.f32 %v110_v25, %v39_v13  ;;  %v140_v34 = vmul.f32 %v110_v25, %v40_v14  ;;  %v114_v35 = vrot.slane %v86_v26, %v93_v8 }
  0x35   :  { %147 = vst [vmem:[#allocation7] sm:$0xff] %v131_v20  ;;  %148 = vst [vmem:[#allocation7 + $0x8] sm:$0xff] %v132_v21  ;;  %v133_v28 = vmul.f32 %v98_v22, %v39_v13  ;;  %v134_v29 = vmul.f32 %v98_v22, %v40_v14  ;;  %v135_v30 = vmul.f32 %v102_v23, %v39_v13 }
  0x36   :  { %v136_v31 = vmul.f32 %v102_v23, %v40_v14  ;;  %v106_v32 = vrot.slane %v89_v24, %v93_v8  ;;  %v118_v36 = vrot.slane %v88_v27, %v93_v8  ;;  %v90_v37 = vcombine.high %v86_v26, %v86_v26  ;;  %155 = vst [vmem:[#allocation7 + $0x40] sm:$0xff] %v139_v33 }
  0x37   :  { %149 = vst [vmem:[#allocation7 + $0x10] sm:$0xff] %v133_v28  ;;  %150 = vst [vmem:[#allocation7 + $0x18] sm:$0xff] %v134_v29  ;;  %v141_v40 = vmul.f32 %v114_v35, %v39_v13  ;;  %v142_v41 = vmul.f32 %v114_v35, %v40_v14 }
  0x38   :  { %151 = vst [vmem:[#allocation7 + $0x20] sm:$0xff] %v135_v30  ;;  %152 = vst [vmem:[#allocation7 + $0x28] sm:$0xff] %v136_v31  ;;  %v137_v38 = vmul.f32 %v106_v32, %v39_v13  ;;  %v138_v39 = vmul.f32 %v106_v32, %v40_v14  ;;  %v143_v42 = vmul.f32 %v118_v36, %v39_v13 }
  0x39   :  { %156 = vst [vmem:[#allocation7 + $0x48] sm:$0xff] %v140_v34  ;;  %v144_v43 = vmul.f32 %v118_v36, %v40_v14  ;;  %v122_v44 = vrot.slane %v90_v37, %v93_v8  ;;  %157 = vst [vmem:[#allocation7 + $0x50] sm:$0xff] %v141_v40 }
  0x3a   :  { %153 = vst [vmem:[#allocation7 + $0x30] sm:$0xff] %v137_v38  ;;  %154 = vst [vmem:[#allocation7 + $0x38] sm:$0xff] %v138_v39 }
  0x3b   :  { %158 = vst [vmem:[#allocation7 + $0x58] sm:$0xff] %v142_v41  ;;  %159 = vst [vmem:[#allocation7 + $0x60] sm:$0xff] %v143_v42  ;;  %v145_v45 = vmul.f32 %v122_v44, %v39_v13  ;;  %v146_v46 = vmul.f32 %v122_v44, %v40_v14 }
  0x3c   :  { %160 = vst [vmem:[#allocation7 + $0x68] sm:$0xff] %v144_v43 }
  0x3d   :  { %161 = vst [vmem:[#allocation7 + $0x70] sm:$0xff] %v145_v45  ;;  %162 = vst [vmem:[#allocation7 + $0x78] sm:$0xff] %v146_v46 }
  0x3e   :  { %243 = shalt.err (!%p240_p6)
}
  0x3f   :  { %s244_s10 = scalar_lea.hbm %s332_s2, 2048 }
  0x40   :  { %p245_p7 = scmp.ne.s32.totalorder %s332_s2, %s244_s10  ;;  %p248_p8 = scmp.lt.u32.totalorder %s244_s10, %s332_s2 }
  0x42   :  { %p250_p9 = pnand %p248_p8, %p245_p7 }
  0x44   :  { %253 = shalt.err (!%p250_p9)
}
  0x45   :  { %174 = dma.vmem_to_hbm [thread:$0]  %s169_s6, 2048, %s332_s2, [#allocation4], %s262_s0, %s262_s0, %s263_s3  }
  0x46   :  { %258 = dma.done.wait [#allocation4], 2048  }
  0x47   :  { %259 = vsyncadd [#allocation4], 4294965248 }
  0x48   :  { %178 = vsyncpa [#allocation3], 1 }
  0x49   :  { %179 = vsyncpa [#allocation6], 1 }
  0x4a   :  { %180 = vsyncpa [#allocation4], 1 }

</bundles_post_ra>
